<compile_context>
chip_gen: v7x
topology: tpu7x:2x2x1
jax: 0.10.0
libtpu: 0.0.40
codegen_flags: <defaults>
</compile_context>

<pallas_src>
import functools
import math

import jax
import jax.numpy as jnp
from jax.experimental import pallas as pl
from jax.experimental.pallas import tpu as pltpu


def _na_kernel(x_ref, w_ref, b_ref, nbr_ref, rbias_ref, o_ref, *,
               batch, n_tok, dim):
    """Whole problem in one invocation: x_ref is (B*N, C)."""
    f32 = jnp.float32
    x = x_ref[...]                                    # (B*N, C)
    w = w_ref[...]                                    # (C, 4C) = [Wq^T|Wk^T|Wv^T|Wo^T]
    b = b_ref[...]                                    # (1, 4C) = [bq|bk|bv|bo]

    # Fused QKV projection: one (B*N, C) x (C, 3C) matmul + packed bias.
    wqkv, wo = w[:, : 3 * dim], w[:, 3 * dim:]
    bqkv, bo = b[:, : 3 * dim], b[:, 3 * dim:]
    qkv = jnp.dot(x, wqkv, preferred_element_type=f32) + bqkv      # (B*N, 3C)
    q = qkv[:, :dim]
    k = qkv[:, dim:2 * dim]
    v = qkv[:, 2 * dim:]

    # One-hot neighbor mask (num_neighbors == 1), built in-kernel from the
    # (N, 1) int32 index vector: mask[i, j] = (j == neighbors[i]).
    col = jax.lax.broadcasted_iota(jnp.int32, (n_tok, n_tok), 1)
    mask = jnp.where(col == nbr_ref[...], 1.0, 0.0).astype(f32)    # (N, N)

    rbias = rbias_ref[0, 0]                           # scalar read from SMEM
    inv_scale = 1.0 / math.sqrt(dim)
    # Hoisted loop invariants: pre-scaled mask and additive bias term, so the
    # per-batch score path is a single multiply-add on the (N, N) tile.
    # Non-neighbor entries stay exactly 0.0, matching the PyTorch semantics of
    # softmax over a zero-initialized (N, N) score matrix.
    mask_s = mask * inv_scale                          # (N, N)
    bias_s = mask * (rbias * inv_scale)                # (N, N)

    # Per-batch attention (batch is tiny and statically unrolled).
    # TODO(synk): the dense (N, N) score / gather matmuls don't scale with N;
    # for large N switch to scalar-prefetched per-row index gathers.
    for bi in range(batch):
        r0 = bi * n_tok                                # Python int -> static slices
        qb = q[r0:r0 + n_tok, :]                       # (N, C)
        kb = k[r0:r0 + n_tok, :]
        vb = v[r0:r0 + n_tok, :]
        # Scores: zero everywhere except neighbor slots ((Q_i.K_nbr + rbias)/sqrt(C)).
        s_full = jax.lax.dot_general(qb, kb, (((1,), (1,)), ((), ())),
                                     preferred_element_type=f32)   # (N, N)
        scaled = mask_s * s_full + bias_s
        # Full-row softmax (zeros at non-neighbor slots participate), exactly
        # matching F.softmax(scores / dim**0.5, dim=-1).
        row_max = jnp.max(scaled, axis=-1, keepdims=True)
        e = jnp.exp(scaled - row_max)
        denom = jnp.sum(e, axis=-1, keepdims=True)
        p = e * pl.reciprocal(denom, approx=False)
        # V_neighbors (nn == 1) as a one-hot gather matmul, then attention.
        v_nb = jnp.dot(mask, vb, preferred_element_type=f32)       # (N, C)
        att = jnp.dot(p, v_nb, preferred_element_type=f32)         # (N, C)
        # Fused fc_out + direct store to an 8-sublane-aligned slice of o_ref
        # (no concatenate / extra VMEM staging buffer).
        o_ref[r0:r0 + n_tok, :] = (
            jnp.dot(att, wo, preferred_element_type=f32) + bo
        ).astype(o_ref.dtype)


def neighborhood_attention_block(x, neighbors, params):
    """x: (B, N, C) f32, neighbors: (N, num_neighbors) int32."""
    B, N, C = x.shape
    num_neighbors = neighbors.shape[1]
    # TODO(synk): the PyTorch forward only type-checks when num_neighbors == 1
    # (fc_out expects last dim == dim, and relative_bias broadcasting also
    # requires it); we reproduce exactly that runnable configuration.
    assert num_neighbors == 1

    # Plain-JAX parameter packing (constant-folded / fused by XLA):
    # weights pre-transposed to (in, out) and packed, biases packed.
    w_all = jnp.concatenate(
        [params["wq"].T, params["wk"].T, params["wv"].T, params["wo"].T],
        axis=1).astype(jnp.float32)                               # (C, 4C)
    b_all = jnp.concatenate(
        [params["bq"], params["bk"], params["bv"], params["bo"]],
        axis=0).reshape(1, 4 * C).astype(jnp.float32)             # (1, 4C)
    rbias = params["relative_bias"].reshape(1, 1).astype(jnp.float32)
    nbr = neighbors.reshape(N, 1).astype(jnp.int32)
    x2d = x.reshape(B * N, C)

    kernel = functools.partial(_na_kernel, batch=B, n_tok=N, dim=C)
    vmem = pltpu.MemorySpace.VMEM
    smem = pltpu.MemorySpace.SMEM
    # Single invocation (grid == ()): whole working set is a few KB of VMEM.
    # TODO(synk): on v7x (2 TCs) a grid=(B,) parallel batch split would engage
    # both cores; at these sizes the single-step version wins on v5e/v6e.
    out2d = pl.pallas_call(
        kernel,
        out_shape=jax.ShapeDtypeStruct((B * N, C), x.dtype),
        in_specs=[
            pl.BlockSpec(memory_space=vmem),   # x2d          (B*N, C)
            pl.BlockSpec(memory_space=vmem),   # packed W     (C, 4C)
            pl.BlockSpec(memory_space=vmem),   # packed bias  (1, 4C)
            pl.BlockSpec(memory_space=vmem),   # neighbor idx (N, 1) int32
            pl.BlockSpec(memory_space=smem),   # relative_bias scalar
        ],
        out_specs=pl.BlockSpec(memory_space=vmem),
    )(x2d, w_all, b_all, nbr, rbias)
    return out2d.reshape(B, N, C)


def _reference(x, neighbors, params):
    """Pure-JAX transcription of the PyTorch forward (for verification)."""
    B, N, C = x.shape
    nnb = neighbors.shape[1]
    q = x @ params["wq"].T + params["bq"]
    k = x @ params["wk"].T + params["bk"]
    v = x @ params["wv"].T + params["bv"]
    scores = jnp.zeros((B, N, N), jnp.float32)
    v_nb = jnp.zeros((B, N, nnb, C), jnp.float32)
    for i in range(N):
        idx = neighbors[i]
        qi = q[:, i:i + 1, :]
        kn = k[:, idx, :]
        vn = v[:, idx, :]
        s = jnp.einsum("bod,bnd->bon", qi, kn)[:, 0, :] + params["relative_bias"]
        scores = scores.at[:, i, idx].set(s)
        v_nb = v_nb.at[:, i].set(vn)
    probs = jax.nn.softmax(scores / C ** 0.5, axis=-1)
    attended = jnp.einsum("bnm,bmc->bnc", probs, v_nb.reshape(B, N, nnb * C))
    return attended @ params["wo"].T + params["bo"]


if __name__ == "__main__":
    B, N, C, NNB = 2, 16, 32, 1  # batch, tokens, dim, num_neighbors

    key = jax.random.PRNGKey(0)
    keys = jax.random.split(key, 10)
    scale = 1.0 / math.sqrt(C)

    def init(k, shape):
        return jax.random.normal(k, shape, jnp.float32) * scale

    params = dict(
        wq=init(keys[1], (C, C)), bq=init(keys[2], (C,)),
        wk=init(keys[3], (C, C)), bk=init(keys[4], (C,)),
        wv=init(keys[5], (C, C)), bv=init(keys[6], (C,)),
        wo=init(keys[7], (C, C)), bo=init(keys[8], (C,)),
        # nn.Parameter(torch.zeros(...)) at init; use a nonzero value here so
        # the relative-bias path is actually exercised.
        relative_bias=jnp.full((NNB, NNB), 0.25, jnp.float32),
    )

    x = jax.random.normal(keys[0], (B, N, C), jnp.float32)
    neighbors = jnp.array([[(i + 3) % N] for i in range(N)], dtype=jnp.int32)  # (N, 1)

    out = neighborhood_attention_block(x, neighbors, params)
    out = jax.block_until_ready(out)

    ref = _reference(x, neighbors, params)
    assert out.shape == (B, N, C)
    max_err = float(jnp.max(jnp.abs(out - ref)))
    assert max_err < 1e-4, f"mismatch vs reference, max abs err = {max_err}"
    print("KERNEL_OK")
</pallas_src>

<mosaic_0001>
module attributes {stable_mosaic.version = 11 : i64} {
  func.func @_na_kernel(%arg0: memref<32x32xf32, #tpu.memory_space<vmem>>, %arg1: memref<32x128xf32, #tpu.memory_space<vmem>>, %arg2: memref<1x128xf32, #tpu.memory_space<vmem>>, %arg3: memref<16x1xi32, #tpu.memory_space<vmem>>, %arg4: memref<1x1xf32, #tpu.memory_space<smem>>, %arg5: memref<32x32xf32, #tpu.memory_space<vmem>>) attributes {dimension_semantics = [], scalar_prefetch = 0 : i64, scratch_operands = 0 : i64, tpu.core_type = #tpu.core_type<tc>} {
    %c0 = arith.constant 0 : index
    %c0_0 = arith.constant 0 : index
    %0 = vector.load %arg0[%c0, %c0_0] : memref<32x32xf32, #tpu.memory_space<vmem>>, vector<32x32xf32>
    %c0_1 = arith.constant 0 : index
    %c0_2 = arith.constant 0 : index
    %1 = vector.load %arg1[%c0_1, %c0_2] : memref<32x128xf32, #tpu.memory_space<vmem>>, vector<32x128xf32>
    %c0_3 = arith.constant 0 : index
    %c0_4 = arith.constant 0 : index
    %2 = vector.load %arg2[%c0_3, %c0_4] : memref<1x128xf32, #tpu.memory_space<vmem>>, vector<1x128xf32>
    %3 = vector.extract_strided_slice %1 {offsets = [0, 0], sizes = [32, 96], strides = [1, 1]} : vector<32x128xf32> to vector<32x96xf32>
    %4 = vector.extract_strided_slice %1 {offsets = [0, 96], sizes = [32, 32], strides = [1, 1]} : vector<32x128xf32> to vector<32x32xf32>
    %5 = vector.extract_strided_slice %2 {offsets = [0, 0], sizes = [1, 96], strides = [1, 1]} : vector<1x128xf32> to vector<1x96xf32>
    %6 = vector.extract_strided_slice %2 {offsets = [0, 96], sizes = [1, 32], strides = [1, 1]} : vector<1x128xf32> to vector<1x32xf32>
    %cst = arith.constant dense<0.000000e+00> : vector<32x96xf32>
    %7 = tpu.matmul %0, %3, %cst {dimension_numbers = #tpu.dot_dimension_numbers<[1], [0], [0], [1], [0, 0, 1, 1], [], []>} : vector<32x32xf32>, vector<32x96xf32>, vector<32x96xf32> -> vector<32x96xf32>
    %8 = vector.broadcast %5 : vector<1x96xf32> to vector<32x96xf32>
    %9 = arith.addf %7, %8 : vector<32x96xf32>
    %10 = vector.extract_strided_slice %9 {offsets = [0, 0], sizes = [32, 32], strides = [1, 1]} : vector<32x96xf32> to vector<32x32xf32>
    %11 = vector.extract_strided_slice %9 {offsets = [0, 32], sizes = [32, 32], strides = [1, 1]} : vector<32x96xf32> to vector<32x32xf32>
    %12 = vector.extract_strided_slice %9 {offsets = [0, 64], sizes = [32, 32], strides = [1, 1]} : vector<32x96xf32> to vector<32x32xf32>
    %13 = tpu.iota {dimensions = array<i32: 1>} : vector<16x16xi32>
    %c0_5 = arith.constant 0 : index
    %c0_6 = arith.constant 0 : index
    %14 = vector.load %arg3[%c0_5, %c0_6] : memref<16x1xi32, #tpu.memory_space<vmem>>, vector<16x1xi32>
    %15 = vector.broadcast %14 : vector<16x1xi32> to vector<16x16xi32>
    %16 = arith.cmpi eq, %13, %15 : vector<16x16xi32>
    %cst_7 = arith.constant 1.000000e+00 : f32
    %cst_8 = arith.constant 0.000000e+00 : f32
    %17 = vector.broadcast %cst_7 : f32 to vector<16x16xf32>
    %18 = vector.broadcast %cst_8 : f32 to vector<16x16xf32>
    %19 = arith.select %16, %17, %18 : vector<16x16xi1>, vector<16x16xf32>
    %c0_9 = arith.constant 0 : index
    %c0_10 = arith.constant 0 : index
    %20 = memref.load %arg4[%c0_9, %c0_10] : memref<1x1xf32, #tpu.memory_space<smem>>
    %cst_11 = arith.constant 0.176776692 : f32
    %21 = vector.broadcast %cst_11 : f32 to vector<16x16xf32>
    %22 = arith.mulf %19, %21 : vector<16x16xf32>
    %cst_12 = arith.constant 0.176776692 : f32
    %23 = arith.mulf %20, %cst_12 : f32
    %24 = vector.broadcast %23 : f32 to vector<16x16xf32>
    %25 = arith.mulf %19, %24 : vector<16x16xf32>
    %26 = vector.extract_strided_slice %10 {offsets = [0, 0], sizes = [16, 32], strides = [1, 1]} : vector<32x32xf32> to vector<16x32xf32>
    %27 = vector.extract_strided_slice %11 {offsets = [0, 0], sizes = [16, 32], strides = [1, 1]} : vector<32x32xf32> to vector<16x32xf32>
    %28 = vector.extract_strided_slice %12 {offsets = [0, 0], sizes = [16, 32], strides = [1, 1]} : vector<32x32xf32> to vector<16x32xf32>
    %cst_13 = arith.constant dense<0.000000e+00> : vector<16x16xf32>
    %29 = tpu.matmul %26, %27, %cst_13 {dimension_numbers = #tpu.dot_dimension_numbers<[1], [1], [0], [0], [0, 0, 1, 0], [], []>} : vector<16x32xf32>, vector<16x32xf32>, vector<16x16xf32> -> vector<16x16xf32>
    %30 = arith.mulf %22, %29 : vector<16x16xf32>
    %31 = arith.addf %30, %25 : vector<16x16xf32>
    %cst_14 = arith.constant dense<0xFF800000> : vector<16xf32>
    %32 = vector.multi_reduction <maximumf>, %31, %cst_14 [1] : vector<16x16xf32> to vector<16xf32>
    %33 = vector.shape_cast %32 : vector<16xf32> to vector<16x1xf32>
    %34 = vector.broadcast %33 : vector<16x1xf32> to vector<16x16xf32>
    %35 = arith.subf %31, %34 : vector<16x16xf32>
    %36 = math.exp %35 : vector<16x16xf32>
    %cst_15 = arith.constant dense<0.000000e+00> : vector<16xf32>
    %37 = vector.multi_reduction <add>, %36, %cst_15 [1] : vector<16x16xf32> to vector<16xf32>
    %38 = vector.shape_cast %37 : vector<16xf32> to vector<16x1xf32>
    %39 = tpu.reciprocal %38 : vector<16x1xf32> -> vector<16x1xf32>
    %40 = vector.broadcast %39 : vector<16x1xf32> to vector<16x16xf32>
    %41 = arith.mulf %36, %40 : vector<16x16xf32>
    %cst_16 = arith.constant dense<0.000000e+00> : vector<16x32xf32>
    %42 = tpu.matmul %19, %28, %cst_16 {dimension_numbers = #tpu.dot_dimension_numbers<[1], [0], [0], [1], [0, 0, 1, 1], [], []>} : vector<16x16xf32>, vector<16x32xf32>, vector<16x32xf32> -> vector<16x32xf32>
    %cst_17 = arith.constant dense<0.000000e+00> : vector<16x32xf32>
    %43 = tpu.matmul %41, %42, %cst_17 {dimension_numbers = #tpu.dot_dimension_numbers<[1], [0], [0], [1], [0, 0, 1, 1], [], []>} : vector<16x16xf32>, vector<16x32xf32>, vector<16x32xf32> -> vector<16x32xf32>
    %cst_18 = arith.constant dense<0.000000e+00> : vector<16x32xf32>
    %44 = tpu.matmul %43, %4, %cst_18 {dimension_numbers = #tpu.dot_dimension_numbers<[1], [0], [0], [1], [0, 0, 1, 1], [], []>} : vector<16x32xf32>, vector<32x32xf32>, vector<16x32xf32> -> vector<16x32xf32>
    %45 = vector.broadcast %6 : vector<1x32xf32> to vector<16x32xf32>
    %46 = arith.addf %44, %45 : vector<16x32xf32>
    %c0_19 = arith.constant 0 : index
    %c0_20 = arith.constant 0 : index
    %47 = vector.load %arg5[%c0_19, %c0_20] : memref<32x32xf32, #tpu.memory_space<vmem>>, vector<16x32xf32>
    tpu.vector_store %arg5[%c0_19, %c0_20], %46 {strides = array<i32>} : memref<32x32xf32, #tpu.memory_space<vmem>>, vector<16x32xf32>,
    %48 = vector.extract_strided_slice %10 {offsets = [16, 0], sizes = [16, 32], strides = [1, 1]} : vector<32x32xf32> to vector<16x32xf32>
    %49 = vector.extract_strided_slice %11 {offsets = [16, 0], sizes = [16, 32], strides = [1, 1]} : vector<32x32xf32> to vector<16x32xf32>
    %50 = vector.extract_strided_slice %12 {offsets = [16, 0], sizes = [16, 32], strides = [1, 1]} : vector<32x32xf32> to vector<16x32xf32>
    %cst_21 = arith.constant dense<0.000000e+00> : vector<16x16xf32>
    %51 = tpu.matmul %48, %49, %cst_21 {dimension_numbers = #tpu.dot_dimension_numbers<[1], [1], [0], [0], [0, 0, 1, 0], [], []>} : vector<16x32xf32>, vector<16x32xf32>, vector<16x16xf32> -> vector<16x16xf32>
    %52 = arith.mulf %22, %51 : vector<16x16xf32>
    %53 = arith.addf %52, %25 : vector<16x16xf32>
    %cst_22 = arith.constant dense<0xFF800000> : vector<16xf32>
    %54 = vector.multi_reduction <maximumf>, %53, %cst_22 [1] : vector<16x16xf32> to vector<16xf32>
    %55 = vector.shape_cast %54 : vector<16xf32> to vector<16x1xf32>
    %56 = vector.broadcast %55 : vector<16x1xf32> to vector<16x16xf32>
    %57 = arith.subf %53, %56 : vector<16x16xf32>
    %58 = math.exp %57 : vector<16x16xf32>
    %cst_23 = arith.constant dense<0.000000e+00> : vector<16xf32>
    %59 = vector.multi_reduction <add>, %58, %cst_23 [1] : vector<16x16xf32> to vector<16xf32>
    %60 = vector.shape_cast %59 : vector<16xf32> to vector<16x1xf32>
    %61 = tpu.reciprocal %60 : vector<16x1xf32> -> vector<16x1xf32>
    %62 = vector.broadcast %61 : vector<16x1xf32> to vector<16x16xf32>
    %63 = arith.mulf %58, %62 : vector<16x16xf32>
    %cst_24 = arith.constant dense<0.000000e+00> : vector<16x32xf32>
    %64 = tpu.matmul %19, %50, %cst_24 {dimension_numbers = #tpu.dot_dimension_numbers<[1], [0], [0], [1], [0, 0, 1, 1], [], []>} : vector<16x16xf32>, vector<16x32xf32>, vector<16x32xf32> -> vector<16x32xf32>
    %cst_25 = arith.constant dense<0.000000e+00> : vector<16x32xf32>
    %65 = tpu.matmul %63, %64, %cst_25 {dimension_numbers = #tpu.dot_dimension_numbers<[1], [0], [0], [1], [0, 0, 1, 1], [], []>} : vector<16x16xf32>, vector<16x32xf32>, vector<16x32xf32> -> vector<16x32xf32>
    %cst_26 = arith.constant dense<0.000000e+00> : vector<16x32xf32>
    %66 = tpu.matmul %65, %4, %cst_26 {dimension_numbers = #tpu.dot_dimension_numbers<[1], [0], [0], [1], [0, 0, 1, 1], [], []>} : vector<16x32xf32>, vector<32x32xf32>, vector<16x32xf32> -> vector<16x32xf32>
    %67 = vector.broadcast %6 : vector<1x32xf32> to vector<16x32xf32>
    %68 = arith.addf %66, %67 : vector<16x32xf32>
    %c16 = arith.constant 16 : index
    %c0_27 = arith.constant 0 : index
    %69 = vector.load %arg5[%c16, %c0_27] : memref<32x32xf32, #tpu.memory_space<vmem>>, vector<16x32xf32>
    tpu.vector_store %arg5[%c16, %c0_27], %68 {strides = array<i32>} : memref<32x32xf32, #tpu.memory_space<vmem>>, vector<16x32xf32>,
    return
  }
}

</mosaic_0001>

<bundles_post_ra>
// kernel: tpu_custom_call.1
= control target key start
LH: loop header
LB: loop body
LE: loop exit
PB: predicated region body
PF: predicated region fallthrough
CT: control target
= control target key end

     0   :  { %11 = vsyncpa [#allocation4], 0  ;;  %s1481_s0 = inlined_call_operand.hbm [shape: f32[32,32], index: 0, kind: input, shape index: {}]   ;;  %s1482_s1 = inlined_call_operand.hbm [shape: f32[32,128], index: 1, kind: input, shape index: {}]   ;;  %s1483_s2 = inlined_call_operand.vmem [shape: f32[1,128], index: 2, kind: input, shape index: {}]   ;;  %s1484_s3 = inlined_call_operand.vmem [shape: s32[16,1], index: 3, kind: input, shape index: {}]   ;;  %s1485_s4 = inlined_call_operand.<no memory space> [shape: f32[1,1], index: 4, kind: input, shape index: {}]   ;;  %s1486_s5 = inlined_call_operand.hbm [shape: f32[32,32], index: 5, kind: output, shape index: {}]  }
   0x1   :  { %12 = vsyncpa [#allocation7], 0 }
   0x2   :  { %13 = vsyncpa [#allocation5], 0  ;;  %s1277_s18 = smov [#allocation3]   ;;  %s1205_s22 = scalar_lea.hbm %s1481_s0, 512 }
   0x3   :  { %s19_s19 = sshll.u32 %s1277_s18, 4  ;;  %p1206_p0 = scmp.ne.s32.totalorder %s1481_s0, %s1205_s22  ;;  %s20_s19 = int_to_ptr.vmem [resolvable:$true] %s19_s19 }
   0x4   :  { %p1209_p1 = scmp.lt.u32.totalorder %s1205_s22, %s1481_s0 }
   0x6   :  { %p1211_p2 = pnand %p1209_p1, %p1206_p0 }
   0x8   :  { %1214 = shalt.err (!%p1211_p2)
}
   0x9   :  { %s1215_s27 = scalar_lea.vmem %s20_s19, 512  ;;  %p1220_p4 = scmp.lt.s32.totalorder %s20_s19, %s20_s19 }
   0xa   :  { %p1216_p3 = scmp.ne.s32.totalorder %s20_s19, %s1215_s27  ;;  %p1221_p5 = scmp.lt.s32.totalorder %s1215_s27, %s1215_s27 }
   0xc   :  { %p1222_p6 = por %p1221_p5, %p1220_p4 }
   0xe   :  { %p1223_p7 = pnand %p1222_p6, %p1216_p3 }
  0x10   :  { %1226 = shalt.err (!%p1223_p7)
}
  0x11   :  { %s1278_s28 = smov 128   ;;  %s1279_s29 = smov 8  }
  0x12   :  { %25 = dma.hbm_to_vmem [thread:$0]  %s1481_s0, 512, %s20_s19, [#allocation4], %s1278_s28, %s1278_s28, %s1279_s29  }
  0x13   :  { %s1280_s7 = smov [#allocation6]   ;;  %s1227_s11 = scalar_lea.hbm %s1482_s1, 512 }
  0x14   :  { %s31_s8 = sshll.u32 %s1280_s7, 4  ;;  %p1228_p8 = scmp.ne.s32.totalorder %s1482_s1, %s1227_s11  ;;  %s32_s8 = int_to_ptr.vmem [resolvable:$true] %s31_s8 }
  0x15   :  { %p1231_p9 = scmp.lt.u32.totalorder %s1227_s11, %s1482_s1 }
  0x17   :  { %p1233_p10 = pnand %p1231_p9, %p1228_p8 }
  0x19   :  { %1236 = shalt.err (!%p1233_p10)
}
  0x1a   :  { %s1237_s16 = scalar_lea.vmem %s32_s8, 512  ;;  %p1242_p12 = scmp.lt.s32.totalorder %s32_s8, %s32_s8 }
  0x1b   :  { %p1238_p11 = scmp.ne.s32.totalorder %s32_s8, %s1237_s16  ;;  %p1243_p13 = scmp.lt.s32.totalorder %s1237_s16, %s1237_s16 }
  0x1d   :  { %p1244_p0 = por %p1243_p13, %p1242_p12 }
  0x1f   :  { %p1245_p1 = pnand %p1244_p0, %p1238_p11 }
  0x21   :  { %1248 = shalt.err (!%p1245_p1)
}
  0x22   :  { %37 = dma.hbm_to_vmem [thread:$0]  %s1482_s1, 512, %s32_s8, [#allocation7], %s1278_s28, %s1278_s28, %s1279_s29  }
  0x23   :  { %1271 = dma.done.wait [#allocation4], 512  }
  0x24   :  { %1272 = vsyncadd [#allocation4], 4294966784 }
  0x25   :  { %1273 = dma.done.wait [#allocation7], 512  }
  0x26   :  { %1274 = vsyncadd [#allocation7], 4294966784  ;;  %v1281_v0 = vmov 0   ;;  %vm65_vm0 = vcmask 261120   ;;  %v1347_v1 = vld [vmem:[#allocation6] sm:$0xff]  ;;  %v1349_v2 = vld [vmem:[#allocation6 + $0x8] sm:$0xff]  ;;  %v163_v30 = vlaneseq }
  0x27   :  { %1163 = vset.pattern.permute.xlu1 %v1281_v0  ;;  %1162 = vset.pattern.permute.xlu0 %v1281_v0  ;;  %v1351_v3 = vld [vmem:[#allocation6 + $0x10] sm:$0xff]  ;;  %v1174_v4 = vpack.i.bf16 %v1349_v2, %v1347_v1  ;;  %v1095_v5 = vpack.c.bf16 %v1349_v2, %v1347_v1  ;;  %v1357_v6 = vld [vmem:[#allocation6 + $0x18] sm:$0xff]  ;;  %v50_v7 = vld [vmem:[#allocation3] sm:$0xff]  ;;  %s1282_s21 = smov 64   ;;  %s1283_s22 = smov 96   ;;  %vm277_vm3 = vcmask 130048  }
  0x28   :  { %v1099_v8 = vpack.c.bf16 %v1357_v6, %v1351_v3  ;;  %1025 = vmatprep.mubr.msk.f32.mxu0 %vm65_vm0, %v50_v7  ;;  %v166_v9 = vld [vmem:[%s1484_s3 + $0x8] sm:$0xff]  ;;  %v1369_v11 = vld [vmem:[%s1483_s2] ss:$0 sm:$0xff]  ;;  %v52_v17 = vld [vmem:[#allocation3 + $0x10] sm:$0xff]  ;;  %v164_v31 = vand.u32 127, %v163_v30  ;;  %v1284_v33 = vmov 0.0   ;;  %v1179_v7 = vpack.i.bf16 %v1357_v6, %v1351_v3 }
  0x29   :  { %1096 = vmatprep.subr.bf16.mxu0 %v1095_v5  ;;  %171 = vperm.xlu1 %1163, %v166_v9   ;;  %v51_v10 = vld [vmem:[#allocation3 + $0x8] sm:$0xff]  ;;  %v53_v18 = vld [vmem:[#allocation3 + $0x18] sm:$0xff]  ;;  %v165_v19 = vld [vmem:[%s1484_s3] sm:$0xff]  ;;  %s180_s25 = smul.f32 0.17677669, %s1485_s4  ;;  %s1285_s4 = smov 32  }
  0x2a   :  { %1098 = vmatpush3.bf16.msra.mxu0 %v1095_v5  ;;  %vm1383_vm1 = vmpackc.low %vm65_vm0, %vm65_vm0  ;;  %s1286_s26 = smov [#allocation8]  }
  0x2b   :  { %1100 = vmatprep.subr.bf16.mxu0 %v1099_v8  ;;  %v181_v36 = vstv %s180_s25  ;;  %s935_s27 = sshll.u32 %s1286_s26, 4  ;;  %s936_s27 = int_to_ptr.vmem [resolvable:$true] %s935_s27 }
  0x2c   :  { %s1249_s30 = scalar_lea.vmem %s936_s27, 512  ;;  %p1254_p3 = scmp.lt.s32.totalorder %s936_s27, %s936_s27 }
  0x2d   :  { %p1250_p2 = scmp.ne.s32.totalorder %s936_s27, %s1249_s30  ;;  %p1255_p4 = scmp.lt.s32.totalorder %s1249_s30, %s1249_s30 }
  0x2e   :  { %1102 = vmatpush3.bf16.msra.mxu0 %v1099_v8 }
  0x2f   :  { %p1256_p5 = por %p1255_p4, %p1254_p3 }
  0x31   :  { %1026 = vmatmul.mubr.msk.f32.vlgmr.msra.gmra.mrb[0].mxu0 %vm65_vm0, %v51_v10  ;;  %p1257_p6 = pnand %p1256_p5, %p1250_p2 }
  0x32   :  { %1028 = vmatprep.mubr.msk.f32.mxu0 %vm65_vm0, %v52_v17 }
  0x35   :  { %1029 = vmatmul.mubr.msk.f32.gmra.mrb[2].mxu0 %vm65_vm0, %v53_v18 }
  0xa8   :  { %v172_v20 = vpop.permute.xlu1 %171 }
  0xa9   :  { %vm174_vm2 = vcmp.eq.s32.totalorder %v164_v31, %v172_v20 }
  0xaa   :  { %v1392_v34 = vsel %vm174_vm2, 1.0, %v1284_v33 }
  0xab   :  { %v1404_v37 = vmul.f32 0.17677669, %v1392_v34  ;;  %v1410_v39 = vmul.f32 %v181_v36, %v1392_v34 }
 0x104   :  { %v1027_v12 = vpop.f32.mrb[0].mxu0 }
 0x105   :  { %v150_v13 = vadd.f32 %v1027_v12, %v1369_v11  ;;  %v144_v14 = vpop.f32.mrb[1].mxu0 }
 0x106   :  { %v145_v15 = vadd.f32 %v1369_v11, %v144_v14 }
 0x108   :  { %1035 = vmatprep.mubr.msk.f32.mxu1 %vm65_vm0, %v145_v15  ;;  %v1164_v16 = vpack.i.bf16 %v150_v13, %v145_v15  ;;  %v1030_v49 = vpop.f32.mrb[2].mxu0 }
 0x109   :  { %v154_v50 = vpop.f32.mrb[3].mxu0  ;;  %v160_v0 = vadd.f32 %v1030_v49, %v1369_v11 }
 0x10a   :  { %1165 = vrot.lane.b32.xlu1 %v1164_v16, %s1282_s21  ;;  %1158 = vrot.lane.b32.xlu0 %v1164_v16, %s1283_s22  ;;  %v155_v5 = vadd.f32 %v1369_v11, %v154_v50 }
 0x10c   :  { %v1169_v8 = vpack.i.bf16 %v160_v0, %v155_v5 }
 0x10e   :  { %168 = vperm.xlu0 %1162, %v165_v19  }
 0x17c   :  { %v1166_v21 = vpop.permute.xlu1 %1165  ;;  %v1159_v22 = vpop.permute.xlu0 %1158 }
 0x17d   :  { %v1168_v23 = vunpack.i.h.bf16 %v1166_v21  ;;  %v1167_v24 = vunpack.i.l.bf16 %v1166_v21  ;;  %v1161_v25 = vunpack.i.h.bf16 %v1159_v22  ;;  %v1160_v26 = vunpack.i.l.bf16 %v1159_v22 }
 0x17f   :  { %v1103_v28 = vpack.c.bf16 %v1161_v25, %v1160_v26  ;;  %v1109_v29 = vpack.c.bf16 %v1168_v23, %v1167_v24 }
 0x181   :  { %1105 = vmatprep.subr.msk.bf16.mxu1 %vm1383_vm1, %v1103_v28 }
 0x182   :  { %1108 = vmatpush3.bf16.xpose.msk.msra.mxu1 %vm1383_vm1, %v1103_v28 }
 0x183   :  { %1110 = vmatprep.subr.bf16.mxu1 %v1109_v29 }
 0x189   :  { %1036 = vmatmul.mubr.msk.f32.vlgmr.msra.gmra.mrb[0].mxu1 %vm65_vm0, %v150_v13 }
 0x18a   :  { %1112 = vmatpush3.bf16.msra.mxu1 %v1109_v29 }
 0x18d   :  { %v169_v32 = vpop.permute.xlu0 %168 }
 0x18e   :  { %vm173_vm4 = vcmp.eq.s32.totalorder %v164_v31, %v169_v32 }
 0x18f   :  { %v1394_v35 = vsel %vm173_vm4, 1.0, %v1284_v33 }
 0x190   :  { %1042 = vmatprep.mubr.msk.f32.mxu1 %vm277_vm3, %v1394_v35  ;;  %v1407_v38 = vmul.f32 0.17677669, %v1394_v35  ;;  %v1415_v44 = vmul.f32 %v181_v36, %v1394_v35 }
 0x191   :  { %1043 = vmatmul.mubr.msk.f32.vlgmr.msra.gmra.mrb[2].mxu1 %vm277_vm3, %v1392_v34 }
 0x25c   :  { %v1037_v40 = vpop.f32.mrb[0].mxu1 }
 0x25d   :  { %v274_v41 = vmul.f32 %v1037_v40, %v1404_v37  ;;  %v264_v42 = vpop.f32.mrb[1].mxu1 }
 0x25e   :  { %v273_v43 = vmul.f32 %v264_v42, %v1407_v38 }
 0x25f   :  { %v276_v45 = vadd.f32 %v274_v41, %v1410_v39 }
 0x260   :  { %v275_v46 = vadd.f32 %v273_v43, %v1415_v44 }
 0x261   :  { %v281_v47 = vsel %vm277_vm3, %v276_v45, -inf }
 0x262   :  { %282 = vmax.xlane.f32.xlu0 %v281_v47  ;;  %v278_v48 = vsel %vm277_vm3, %v275_v46, -inf }
 0x263   :  { %279 = vmax.xlane.f32.xlu1 %v278_v48 }
 0x264   :  { %v1044_v51 = vpop.f32.mrb[2].mxu1 }
 0x265   :  { %v378_v52 = vpop.f32.mrb[3].mxu1 }
 0x266   :  { %v1113_v53 = vpack.c.bf16 %v1044_v51, %v378_v52 }
 0x268   :  { %1114 = vmatprep.subr.bf16.mxu0 %v1113_v53 }
 0x269   :  { %1116 = vmatpush3.bf16.msra.mxu0 %v1113_v53 }
 0x2ef   :  { %v283_v54 = vpop.xlane.xlu0 %282 }
 0x2f0   :  { %v285_v55 = vsub.f32 %v276_v45, %v283_v54  ;;  %v280_v56 = vpop.xlane.xlu1 %279 }
 0x2f1   :  { %v284_v57 = vsub.f32 %v275_v46, %v280_v56 }
 0x2f2   :  { %v288_v58 = vmul.f32 1.442695, %v285_v55 }
 0x2f3   :  { %v286_v59 = vmul.f32 1.442695, %v284_v57 }
 0x2f4   :  { %1189 = vpow2.f32 %v288_v58 }
 0x2f5   :  { %1191 = vpow2.f32 %v286_v59 }
 0x2fe   :  { %v1190_v60 = vpop.eup %1189 }
 0x2ff   :  { %v1192_v61 = vpop.eup %1191  ;;  %v293_v62 = vsel %vm277_vm3, %v1190_v60, 0.0 }
 0x300   :  { %294 = vadd.xlane.f32.xlu1 %v293_v62  ;;  %v290_v63 = vsel %vm277_vm3, %v1192_v61, 0.0 }
 0x301   :  { %291 = vadd.xlane.f32.xlu0 %v290_v63 }
 0x311   :  { %1175 = vrot.lane.b32.xlu1 %v1174_v4, %s1285_s4 }
 0x315   :  { %1180 = vrot.lane.b32.xlu1 %v1179_v7, %s1285_s4 }
 0x317   :  { %1170 = vrot.lane.b32.xlu0 %v1169_v8, %s1283_s22 }
 0x31b   :  { %1185 = vrot.lane.b32.xlu0 %v1169_v8, %s1282_s21 }
 0x38d   :  { %v295_v9 = vpop.xlane.xlu1 %294 }
 0x38e   :  { %1193 = vrcp.f32 %v295_v9  ;;  %v292_v10 = vpop.xlane.xlu0 %291 }
 0x38f   :  { %1195 = vrcp.f32 %v292_v10 }
 0x391   :  { %v1176_v12 = vpop.permute.xlu1 %1175 }
 0x392   :  { %v1178_v13 = vunpack.i.h.bf16 %v1176_v12  ;;  %v1177_v14 = vunpack.i.l.bf16 %v1176_v12  ;;  %v1171_v15 = vpop.permute.xlu0 %1170 }
 0x393   :  { %v1173_v1 = vunpack.i.h.bf16 %v1171_v15  ;;  %v1172_v2 = vunpack.i.l.bf16 %v1171_v15 }
 0x394   :  { %v1117_v4 = vpack.c.bf16 %v1178_v13, %v1177_v14 }
 0x395   :  { %v1125_v16 = vpack.c.bf16 %v1173_v1, %v1172_v2  ;;  %v1181_v3 = vpop.permute.xlu1 %1180 }
 0x396   :  { %v1183_v6 = vunpack.i.h.bf16 %v1181_v3  ;;  %v1182_v17 = vunpack.i.l.bf16 %v1181_v3  ;;  %v1186_v18 = vpop.permute.xlu0 %1185  ;;  %1118 = vmatprep.subr.bf16.mxu1 %v1117_v4 }
 0x397   :  { %v1188_v19 = vunpack.i.h.bf16 %v1186_v18  ;;  %v1187_v20 = vunpack.i.l.bf16 %v1186_v18  ;;  %1120 = vmatpush3.bf16.msra.mxu1 %v1117_v4  ;;  %1127 = vmatprep.subr.msk.bf16.mxu0 %vm1383_vm1, %v1125_v16 }
 0x398   :  { %v1194_v21 = vpop.eup %1193  ;;  %v1121_v22 = vpack.c.bf16 %v1183_v6, %v1182_v17 }
 0x399   :  { %v1196_v23 = vpop.eup %1195  ;;  %v1131_v24 = vpack.c.bf16 %v1188_v19, %v1187_v20  ;;  %v299_v26 = vmul.f32 %v1194_v21, %v1190_v60 }
 0x39a   :  { %1122 = vmatprep.subr.bf16.mxu1 %v1121_v22  ;;  %v298_v25 = vmul.f32 %v1196_v23, %v1192_v61 }
 0x39b   :  { %1124 = vmatpush3.bf16.msra.mxu1 %v1121_v22 }
 0x39c   :  { %1049 = vmatprep.mubr.msk.f32.mxu0 %vm277_vm3, %v298_v25  ;;  %1132 = vmatprep.subr.bf16.mxu1 %v1131_v24 }
 0x39d   :  { %1050 = vmatmul.mubr.msk.f32.vlgmr.msra.gmra.mrb[4].mxu0 %vm277_vm3, %v299_v26 }
 0x39e   :  { %1130 = vmatpush3.bf16.xpose.msk.msra.mxu0 %vm1383_vm1, %v1125_v16  ;;  %1067 = vmatprep.mubr.msk.f32.mxu0 %vm65_vm0, %v155_v5 }
 0x3a5   :  { %1068 = vmatmul.mubr.msk.f32.vlgmr.msra.gmra.mrb[6].mxu0 %vm65_vm0, %v160_v0 }
 0x470   :  { %v1051_v28 = vpop.f32.mrb[4].mxu0 }
 0x471   :  { %v459_v29 = vpop.f32.mrb[5].mxu0 }
 0x472   :  { %1060 = vmatprep.mubr.msk.f32.mxu1 %vm65_vm0, %v459_v29 }
 0x473   :  { %1061 = vmatmul.mubr.msk.f32.vlgmr.msra.gmra.mrb[4].mxu1 %vm65_vm0, %v1051_v28 }
 0x474   :  { %1134 = vmatpush3.bf16.msra.mxu1 %v1131_v24  ;;  %1074 = vmatprep.mubr.msk.f32.mxu1 %vm277_vm3, %v1394_v35 }
 0x475   :  { %1140 = vmatprep.subr.bf16.mxu1 %v1117_v4 }
 0x477   :  { %1075 = vmatmul.mubr.msk.f32.vlgmr.msra.gmra.mrb[6].mxu1 %vm277_vm3, %v1392_v34 }
 0x478   :  { %v1069_v27 = vpop.f32.mrb[6].mxu0  ;;  %1142 = vmatpush3.bf16.msra.mxu1 %v1117_v4 }
 0x479   :  { %v660_v30 = vmul.f32 %v1069_v27, %v1404_v37  ;;  %v650_v31 = vpop.f32.mrb[7].mxu0  ;;  %1144 = vmatprep.subr.bf16.mxu1 %v1121_v22 }
 0x47a   :  { %v659_v32 = vmul.f32 %v650_v31, %v1407_v38 }
 0x47b   :  { %v662_v33 = vadd.f32 %v660_v30, %v1410_v39 }
 0x47c   :  { %v661_v36 = vadd.f32 %v659_v32, %v1415_v44  ;;  %1146 = vmatpush3.bf16.msra.mxu1 %v1121_v22 }
 0x47d   :  { %v666_v40 = vsel %vm277_vm3, %v662_v33, -inf }
 0x47e   :  { %667 = vmax.xlane.f32.xlu0 %v666_v40  ;;  %v663_v35 = vsel %vm277_vm3, %v661_v36, -inf }
 0x47f   :  { %664 = vmax.xlane.f32.xlu1 %v663_v35 }
 0x50b   :  { %v668_v34 = vpop.xlane.xlu0 %667 }
 0x50c   :  { %v670_v41 = vsub.f32 %v662_v33, %v668_v34  ;;  %v665_v42 = vpop.xlane.xlu1 %664 }
 0x50d   :  { %v669_v43 = vsub.f32 %v661_v36, %v665_v42 }
 0x50e   :  { %v673_v37 = vmul.f32 1.442695, %v670_v41 }
 0x50f   :  { %v671_v45 = vmul.f32 1.442695, %v669_v43 }
 0x510   :  { %1197 = vpow2.f32 %v673_v37 }
 0x511   :  { %1199 = vpow2.f32 %v671_v45 }
 0x51a   :  { %v1198_v38 = vpop.eup %1197 }
 0x51b   :  { %v1200_v46 = vpop.eup %1199  ;;  %v678_v39 = vsel %vm277_vm3, %v1198_v38, 0.0 }
 0x51c   :  { %679 = vadd.xlane.f32.xlu1 %v678_v39  ;;  %v675_v44 = vsel %vm277_vm3, %v1200_v46, 0.0 }
 0x51d   :  { %676 = vadd.xlane.f32.xlu0 %v675_v44 }
 0x533   :  { %484 = vrot.lane.b32.xlu0 %v1369_v11, %s1285_s4 }
 0x546   :  { %v1062_v47 = vpop.f32.mrb[4].mxu1 }
 0x547   :  { %v559_v48 = vpop.f32.mrb[5].mxu1 }
 0x54a   :  { %v1076_v49 = vpop.f32.mrb[6].mxu1 }
 0x54b   :  { %v757_v50 = vpop.f32.mrb[7].mxu1 }
 0x54c   :  { %v1135_v51 = vpack.c.bf16 %v1076_v49, %v757_v50 }
 0x54e   :  { %1136 = vmatprep.subr.bf16.mxu0 %v1135_v51 }
 0x54f   :  { %1138 = vmatpush3.bf16.msra.mxu0 %v1135_v51 }
 0x5a9   :  { %v680_v52 = vpop.xlane.xlu1 %679 }
 0x5aa   :  { %1201 = vrcp.f32 %v680_v52  ;;  %v677_v53 = vpop.xlane.xlu0 %676 }
 0x5ab   :  { %1203 = vrcp.f32 %v677_v53 }
 0x5ae   :  { %v485_v54 = vpop.permute.xlu0 %484 }
 0x5af   :  { %v560_v55 = vadd.f32 %v559_v48, %v485_v54  ;;  %v565_v56 = vadd.f32 %v1062_v47, %v485_v54 }
 0x5b1   :  { %568 = vst.msk [vmem:[#allocation8] sm:$0xff] %vm65_vm0, %v560_v55  ;;  %569 = vst.msk [vmem:[#allocation8 + $0x8] sm:$0xff] %vm65_vm0, %v565_v56 }
 0x5b4   :  { %v1202_v57 = vpop.eup %1201 }
 0x5b5   :  { %v1204_v11 = vpop.eup %1203  ;;  %v684_v59 = vmul.f32 %v1202_v57, %v1198_v38 }
 0x5b6   :  { %v683_v58 = vmul.f32 %v1204_v11, %v1200_v46 }
 0x5b8   :  { %1081 = vmatprep.mubr.msk.f32.mxu0 %vm277_vm3, %v683_v58 }
 0x5b9   :  { %1082 = vmatmul.mubr.msk.f32.vlgmr.msra.gmra.mrb[8].mxu0 %vm277_vm3, %v684_v59 }
 0x68c   :  { %v1083_v60 = vpop.f32.mrb[8].mxu0 }
 0x68d   :  { %v838_v61 = vpop.f32.mrb[9].mxu0 }
 0x68e   :  { %1092 = vmatprep.mubr.msk.f32.mxu1 %vm65_vm0, %v838_v61 }
 0x68f   :  { %1093 = vmatmul.mubr.msk.f32.vlgmr.msra.gmra.mrb[8].mxu1 %vm65_vm0, %v1083_v60 }
 0x762   :  { %v1094_v62 = vpop.f32.mrb[8].mxu1 }
 0x763   :  { %v925_v63 = vadd.f32 %v1094_v62, %v485_v54  ;;  %v919_v0 = vpop.f32.mrb[9].mxu1 }
 0x764   :  { %v920_v5 = vadd.f32 %v919_v0, %v485_v54 }
 0x765   :  { %929 = vst.msk [vmem:[#allocation8 + $0x18] sm:$0xff] %vm65_vm0, %v925_v63 }
 0x766   :  { %928 = vst.msk [vmem:[#allocation8 + $0x10] sm:$0xff] %vm65_vm0, %v920_v5 }
 0x767   :  { %1260 = shalt.err (!%p1257_p6)
}
 0x768   :  { %s1261_s8 = scalar_lea.hbm %s1486_s5, 512 }
 0x769   :  { %p1262_p7 = scmp.ne.s32.totalorder %s1486_s5, %s1261_s8  ;;  %p1265_p8 = scmp.lt.u32.totalorder %s1261_s8, %s1486_s5 }
 0x76b   :  { %p1267_p9 = pnand %p1265_p8, %p1262_p7 }
 0x76d   :  { %1270 = shalt.err (!%p1267_p9)
}
 0x76e   :  { %941 = dma.vmem_to_hbm [thread:$0]  %s936_s27, 512, %s1486_s5, [#allocation5], %s1278_s28, %s1278_s28, %s1279_s29  }
 0x76f   :  { %1275 = dma.done.wait [#allocation5], 512  }
 0x770   :  { %1276 = vsyncadd [#allocation5], 4294966784 }
 0x771   :  { %945 = vsyncpa [#allocation4], 1 }
 0x772   :  { %946 = vsyncpa [#allocation7], 1 }
 0x773   :  { %947 = vsyncpa [#allocation5], 1 }

</bundles_post_ra>
